<compile_context>
chip_gen: v7x
topology: tpu7x:2x2x1
jax: 0.10.0
libtpu: 0.0.40
codegen_flags: <defaults>
</compile_context>

<pallas_src>
import functools

import jax
import jax.numpy as jnp
from jax.experimental import pallas as pl
from jax.experimental.pallas import tpu as pltpu

KH = KW = 3
CIN = 3
COUT = 10
HIDDEN = 25

LANE = 128
BN_CAP = 1024        # max batch rows per grid step
BN_ALIGN = 16        # bf16 sublane packing


def _round_up(x, m):
    return (x + m - 1) // m * m


# ------------------------------ Pallas kernel -------------------------------

def _fused_convnet_kernel(x_ref, w0_ref, b0_ref, w1_ref, b1_ref, w2_ref,
                          b2_ref, out_ref):
    # x:   (BN, K0P)  flattened image (zero-padded to K0P), bf16
    # w0:  (K0P, F0)  unrolled (Toeplitz) conv weight, bf16
    # b0:  (1, F0)    conv bias broadcast over spatial positions, f32
    # w1:  (F0, HP)   dense1 weight (hidden padded to HP), bf16; b1: (1, HP) f32
    # w2:  (HP, ODP)  dense2 weight (out padded to ODP), bf16;  b2: (1, ODP) f32
    # out: (BN, ODP)  f32
    h0 = jnp.dot(x_ref[...], w0_ref[...], preferred_element_type=jnp.float32)
    h0 = jnp.maximum(h0 + b0_ref[...], 0.0)                 # conv+flatten+ReLU
    h1 = jnp.dot(h0.astype(jnp.bfloat16), w1_ref[...],
                 preferred_element_type=jnp.float32)
    h1 = jnp.maximum(h1 + b1_ref[...], 0.0)                 # dense1 + ReLU
    h2 = jnp.dot(h1.astype(jnp.bfloat16), w2_ref[...],
                 preferred_element_type=jnp.float32)
    out_ref[...] = jnp.maximum(h2 + b2_ref[...], 0.0)       # dense2 + ReLU


def _fused_call(x_flat, w0, b0, w1, b1, w2, b2, bn):
    n_pad, k0p = x_flat.shape
    f0 = w0.shape[1]
    hp = w1.shape[1]
    odp = w2.shape[1]
    grid = (n_pad // bn,)
    return pl.pallas_call(
        _fused_convnet_kernel,
        out_shape=jax.ShapeDtypeStruct((n_pad, odp), jnp.float32),
        grid_spec=pltpu.PrefetchScalarGridSpec(
            num_scalar_prefetch=0,
            grid=grid,
            in_specs=[
                pl.BlockSpec((bn, k0p), lambda i: (i, 0)),   # x tile
                pl.BlockSpec((k0p, f0), lambda i: (0, 0)),   # resident weights
                pl.BlockSpec((1, f0), lambda i: (0, 0)),
                pl.BlockSpec((f0, hp), lambda i: (0, 0)),
                pl.BlockSpec((1, hp), lambda i: (0, 0)),
                pl.BlockSpec((hp, odp), lambda i: (0, 0)),
                pl.BlockSpec((1, odp), lambda i: (0, 0)),
            ],
            out_specs=pl.BlockSpec((bn, odp), lambda i: (i, 0)),
        ),
        compiler_params=pltpu.CompilerParams(
            dimension_semantics=("parallel",),
            vmem_limit_bytes=48 * 1024 * 1024),
    )(x_flat, w0, b0, w1, b1, w2, b2)


# --------------------------- parameter preparation ---------------------------

def prepare_params(params, input_hw):
    """One-time re-layout of the torch parameters (bf16 matmul operands,
    f32 biases, all padded to MXU/lane-friendly shapes)."""
    h, w = input_hw
    oh, ow = h - KH + 1, w - KW + 1
    s = oh * ow
    k0 = CIN * h * w
    k0p = _round_up(k0, LANE)            # 300 -> 384
    f0 = COUT * s                        # 640 (matches dense1 fan-in)
    hp = _round_up(HIDDEN, LANE)         # 25  -> 128
    od = params["d2_w"].shape[0]
    odp = _round_up(od, LANE)            # out_dim -> 128
    assert params["d1_w"].shape[1] == f0

    # Unrolled (Toeplitz) conv weight: push an identity input basis through
    # the conv once, so flatten(conv(x)) == x_flat @ w0 exactly, with torch's
    # flatten order (feature = co*S + oh*OW + ow) built in.
    eye = jnp.eye(k0, dtype=jnp.float32).reshape(k0, CIN, h, w)
    cols = jax.lax.conv_general_dilated(
        eye, params["conv_w"].astype(jnp.float32),
        window_strides=(1, 1), padding="VALID",
        dimension_numbers=("NCHW", "OIHW", "NCHW"))          # (K0, CO, OH, OW)
    w0 = cols.reshape(k0, f0)
    w0 = jnp.pad(w0, ((0, k0p - k0), (0, 0)))
    b0 = jnp.repeat(params["conv_b"].astype(jnp.float32), s).reshape(1, f0)

    w1 = jnp.pad(params["d1_w"].astype(jnp.float32).T,
                 ((0, 0), (0, hp - HIDDEN)))                 # (F0, HP)
    b1 = jnp.pad(params["d1_b"].astype(jnp.float32),
                 (0, hp - HIDDEN)).reshape(1, hp)
    w2 = jnp.pad(params["d2_w"].astype(jnp.float32).T,
                 ((0, hp - HIDDEN), (0, odp - od)))          # (HP, ODP)
    b2 = jnp.pad(params["d2_b"].astype(jnp.float32),
                 (0, odp - od)).reshape(1, odp)

    return {
        "w0": w0.astype(jnp.bfloat16), "b0": b0,
        "w1": w1.astype(jnp.bfloat16), "b1": b1,
        "w2": w2.astype(jnp.bfloat16), "b2": b2,
        "k0": k0, "k0p": k0p, "od": od,
    }


# ------------------------------- forward (JAX) --------------------------------

def _choose_bn(n):
    na = _round_up(n, BN_ALIGN)
    # >= 2 grid steps for moderate batches so v7x megacore sharding engages,
    # without padding tiny batches up to a huge tile.
    min_steps = 2 if na >= 2 * BN_ALIGN else 1
    steps = max(min_steps, -(-na // BN_CAP))
    bn = _round_up(-(-na // steps), BN_ALIGN)
    return bn, bn * steps


@functools.partial(jax.jit, static_argnames=("k0", "k0p", "od"))
def _forward_impl(x, w0, b0, w1, b1, w2, b2, *, k0, k0p, od):
    n = x.shape[0]
    bn, n_pad = _choose_bn(n)
    x_flat = x.reshape(n, -1).astype(jnp.bfloat16)          # (N, C*H*W)
    x_flat = jnp.pad(x_flat, ((0, n_pad - n), (0, k0p - k0)))
    out = _fused_call(x_flat, w0, b0, w1, b1, w2, b2, bn)
    return out[:n, :od]


def convnet_forward(x, packed):
    return _forward_impl(
        x, packed["w0"], packed["b0"], packed["w1"], packed["b1"],
        packed["w2"], packed["b2"],
        k0=packed["k0"], k0p=packed["k0p"], od=packed["od"])


def ref_forward(x, params):
    y = jax.lax.conv_general_dilated(
        x, params["conv_w"], window_strides=(1, 1), padding="VALID",
        dimension_numbers=("NCHW", "OIHW", "NCHW"))
    y = jnp.maximum(y + params["conv_b"][None, :, None, None], 0.0)
    y = y.reshape(x.shape[0], -1)
    y = jnp.maximum(y @ params["d1_w"].T + params["d1_b"], 0.0)
    y = jnp.maximum(y @ params["d2_w"].T + params["d2_b"], 0.0)
    return y


# ---------------------------------- main --------------------------------------

if __name__ == "__main__":
    out_dim = 4
    key = jax.random.PRNGKey(0)
    kx, kx2, k1, k2, k3, k4, k5, k6 = jax.random.split(key, 8)
    params = {
        "conv_w": 0.1 * jax.random.normal(k1, (COUT, CIN, KH, KW), jnp.float32),
        "conv_b": 0.1 * jax.random.normal(k2, (COUT,), jnp.float32),
        "d1_w": 0.05 * jax.random.normal(k3, (HIDDEN, 640), jnp.float32),
        "d1_b": 0.05 * jax.random.normal(k4, (HIDDEN,), jnp.float32),
        "d2_w": 0.05 * jax.random.normal(k5, (out_dim, HIDDEN), jnp.float32),
        "d2_b": 0.05 * jax.random.normal(k6, (out_dim,), jnp.float32),
    }

    # dense1 expects 640 = 10 channels * 8*8 spatial => input is (N, 3, 10, 10).
    packed = prepare_params(params, input_hw=(10, 10))

    # Two cases: tiny batch (grid=(1,)) and a batch that exercises multi-step
    # grid + padded final tile (N=50 -> bn=32, 2 grid steps).
    for name, xk, n in (("small", kx, 2), ("multi-tile", kx2, 50)):
        x = jax.random.normal(xk, (n, CIN, 10, 10), jnp.float32)
        out = jax.block_until_ready(convnet_forward(x, packed))
        ref = jax.block_until_ready(ref_forward(x, params))
        assert out.shape == (n, out_dim), (name, out.shape)
        # bf16 matmul operands with f32 accumulation: tolerance loosened
        # accordingly (review's correctness note).
        assert jnp.allclose(out, ref, atol=3e-2, rtol=3e-2), (
            name, float(jnp.max(jnp.abs(out - ref))))

    print("KERNEL_OK")
</pallas_src>

<mosaic_0001>
module attributes {stable_mosaic.version = 11 : i64} {
  func.func @_fused_convnet_kernel(%arg0: i32, %arg1: memref<16x384xbf16, #tpu.memory_space<vmem>>, %arg2: memref<384x640xbf16, #tpu.memory_space<vmem>>, %arg3: memref<1x640xf32, #tpu.memory_space<vmem>>, %arg4: memref<640x128xbf16, #tpu.memory_space<vmem>>, %arg5: memref<1x128xf32, #tpu.memory_space<vmem>>, %arg6: memref<128x128xbf16, #tpu.memory_space<vmem>>, %arg7: memref<1x128xf32, #tpu.memory_space<vmem>>, %arg8: memref<16x128xf32, #tpu.memory_space<vmem>>) attributes {dimension_semantics = [#tpu.dimension_semantics<parallel>], iteration_bounds = array<i64: 1>, scalar_prefetch = 0 : i64, scratch_operands = 0 : i64, tpu.core_type = #tpu.core_type<tc>, window_params = [{transform_indices = @transform_0, window_bounds = array<i64: 16, 384>}, {pipeline_mode = #tpu.pipeline_mode<synchronous>, transform_indices = @transform_1, window_bounds = array<i64: 384, 640>}, {pipeline_mode = #tpu.pipeline_mode<synchronous>, transform_indices = @transform_2, window_bounds = array<i64: 1, 640>}, {pipeline_mode = #tpu.pipeline_mode<synchronous>, transform_indices = @transform_3, window_bounds = array<i64: 640, 128>}, {pipeline_mode = #tpu.pipeline_mode<synchronous>, transform_indices = @transform_4, window_bounds = array<i64: 1, 128>}, {pipeline_mode = #tpu.pipeline_mode<synchronous>, transform_indices = @transform_5, window_bounds = array<i64: 128, 128>}, {pipeline_mode = #tpu.pipeline_mode<synchronous>, transform_indices = @transform_6, window_bounds = array<i64: 1, 128>}, {transform_indices = @transform_7, window_bounds = array<i64: 16, 128>}]} {
    %c0 = arith.constant 0 : index
    %c0_0 = arith.constant 0 : index
    %0 = vector.load %arg1[%c0, %c0_0] : memref<16x384xbf16, #tpu.memory_space<vmem>>, vector<16x384xbf16>
    %c0_1 = arith.constant 0 : index
    %c0_2 = arith.constant 0 : index
    %1 = vector.load %arg2[%c0_1, %c0_2] : memref<384x640xbf16, #tpu.memory_space<vmem>>, vector<384x640xbf16>
    %cst = arith.constant dense<0.000000e+00> : vector<16x640xf32>
    %2 = tpu.matmul %0, %1, %cst {dimension_numbers = #tpu.dot_dimension_numbers<[1], [0], [0], [1], [0, 0, 1, 1], [], []>} : vector<16x384xbf16>, vector<384x640xbf16>, vector<16x640xf32> -> vector<16x640xf32>
    %c0_3 = arith.constant 0 : index
    %c0_4 = arith.constant 0 : index
    %3 = vector.load %arg3[%c0_3, %c0_4] : memref<1x640xf32, #tpu.memory_space<vmem>>, vector<1x640xf32>
    %4 = vector.broadcast %3 : vector<1x640xf32> to vector<16x640xf32>
    %5 = arith.addf %2, %4 : vector<16x640xf32>
    %cst_5 = arith.constant 0.000000e+00 : f32
    %6 = vector.broadcast %cst_5 : f32 to vector<16x640xf32>
    %7 = arith.maximumf %5, %6 : vector<16x640xf32>
    %8 = arith.truncf %7 : vector<16x640xf32> to vector<16x640xbf16>
    %c0_6 = arith.constant 0 : index
    %c0_7 = arith.constant 0 : index
    %9 = vector.load %arg4[%c0_6, %c0_7] : memref<640x128xbf16, #tpu.memory_space<vmem>>, vector<640x128xbf16>
    %cst_8 = arith.constant dense<0.000000e+00> : vector<16x128xf32>
    %10 = tpu.matmul %8, %9, %cst_8 {dimension_numbers = #tpu.dot_dimension_numbers<[1], [0], [0], [1], [0, 0, 1, 1], [], []>} : vector<16x640xbf16>, vector<640x128xbf16>, vector<16x128xf32> -> vector<16x128xf32>
    %c0_9 = arith.constant 0 : index
    %c0_10 = arith.constant 0 : index
    %11 = vector.load %arg5[%c0_9, %c0_10] : memref<1x128xf32, #tpu.memory_space<vmem>>, vector<1x128xf32>
    %12 = vector.broadcast %11 : vector<1x128xf32> to vector<16x128xf32>
    %13 = arith.addf %10, %12 : vector<16x128xf32>
    %cst_11 = arith.constant 0.000000e+00 : f32
    %14 = vector.broadcast %cst_11 : f32 to vector<16x128xf32>
    %15 = arith.maximumf %13, %14 : vector<16x128xf32>
    %16 = arith.truncf %15 : vector<16x128xf32> to vector<16x128xbf16>
    %c0_12 = arith.constant 0 : index
    %c0_13 = arith.constant 0 : index
    %17 = vector.load %arg6[%c0_12, %c0_13] : memref<128x128xbf16, #tpu.memory_space<vmem>>, vector<128x128xbf16>
    %cst_14 = arith.constant dense<0.000000e+00> : vector<16x128xf32>
    %18 = tpu.matmul %16, %17, %cst_14 {dimension_numbers = #tpu.dot_dimension_numbers<[1], [0], [0], [1], [0, 0, 1, 1], [], []>} : vector<16x128xbf16>, vector<128x128xbf16>, vector<16x128xf32> -> vector<16x128xf32>
    %c0_15 = arith.constant 0 : index
    %c0_16 = arith.constant 0 : index
    %19 = vector.load %arg7[%c0_15, %c0_16] : memref<1x128xf32, #tpu.memory_space<vmem>>, vector<1x128xf32>
    %20 = vector.broadcast %19 : vector<1x128xf32> to vector<16x128xf32>
    %21 = arith.addf %18, %20 : vector<16x128xf32>
    %cst_17 = arith.constant 0.000000e+00 : f32
    %22 = vector.broadcast %cst_17 : f32 to vector<16x128xf32>
    %23 = arith.maximumf %21, %22 : vector<16x128xf32>
    %c0_18 = arith.constant 0 : index
    %c0_19 = arith.constant 0 : index
    %24 = vector.load %arg8[%c0_18, %c0_19] : memref<16x128xf32, #tpu.memory_space<vmem>>, vector<16x128xf32>
    tpu.vector_store %arg8[%c0_18, %c0_19], %23 {strides = array<i32>} : memref<16x128xf32, #tpu.memory_space<vmem>>, vector<16x128xf32>,
    return
  }
  func.func @transform_0(%arg0: i32) -> (i32, i32) {
    %c0_i32 = arith.constant 0 : i32
    %c0_i32_0 = arith.constant 0 : i32
    return %arg0, %c0_i32 : i32, i32
  }
  func.func @transform_1(%arg0: i32) -> (i32, i32) {
    %c0_i32 = arith.constant 0 : i32
    %c0_i32_0 = arith.constant 0 : i32
    %c0_i32_1 = arith.constant 0 : i32
    return %c0_i32, %c0_i32_0 : i32, i32
  }
  func.func @transform_2(%arg0: i32) -> (i32, i32) {
    %c0_i32 = arith.constant 0 : i32
    %c0_i32_0 = arith.constant 0 : i32
    %c0_i32_1 = arith.constant 0 : i32
    return %c0_i32, %c0_i32_0 : i32, i32
  }
  func.func @transform_3(%arg0: i32) -> (i32, i32) {
    %c0_i32 = arith.constant 0 : i32
    %c0_i32_0 = arith.constant 0 : i32
    %c0_i32_1 = arith.constant 0 : i32
    return %c0_i32, %c0_i32_0 : i32, i32
  }
  func.func @transform_4(%arg0: i32) -> (i32, i32) {
    %c0_i32 = arith.constant 0 : i32
    %c0_i32_0 = arith.constant 0 : i32
    %c0_i32_1 = arith.constant 0 : i32
    return %c0_i32, %c0_i32_0 : i32, i32
  }
  func.func @transform_5(%arg0: i32) -> (i32, i32) {
    %c0_i32 = arith.constant 0 : i32
    %c0_i32_0 = arith.constant 0 : i32
    %c0_i32_1 = arith.constant 0 : i32
    return %c0_i32, %c0_i32_0 : i32, i32
  }
  func.func @transform_6(%arg0: i32) -> (i32, i32) {
    %c0_i32 = arith.constant 0 : i32
    %c0_i32_0 = arith.constant 0 : i32
    %c0_i32_1 = arith.constant 0 : i32
    return %c0_i32, %c0_i32_0 : i32, i32
  }
  func.func @transform_7(%arg0: i32) -> (i32, i32) {
    %c0_i32 = arith.constant 0 : i32
    %c0_i32_0 = arith.constant 0 : i32
    return %arg0, %c0_i32 : i32, i32
  }
}

</mosaic_0001>

<bundles_post_ra>
// kernel: _forward_impl.1
= control target key start
LH: loop header
LB: loop body
LE: loop exit
PB: predicated region body
PF: predicated region fallthrough
CT: control target
= control target key end

     0   :  { %12 = vsyncpa [#allocation3], 0  ;;  %s2506_s0 = inlined_call_operand.vmem [shape: bf16[16,384], index: 0, kind: input, shape index: {}]   ;;  %s2507_s1 = inlined_call_operand.hbm [shape: bf16[384,640], index: 1, kind: input, shape index: {}]   ;;  %s2508_s2 = inlined_call_operand.vmem [shape: f32[1,640], index: 2, kind: input, shape index: {}]   ;;  %s2509_s3 = inlined_call_operand.hbm [shape: bf16[640,128], index: 3, kind: input, shape index: {}]   ;;  %s2510_s4 = inlined_call_operand.vmem [shape: f32[1,128], index: 4, kind: input, shape index: {}]   ;;  %s2511_s5 = inlined_call_operand.vmem [shape: bf16[128,128], index: 5, kind: input, shape index: {}]   ;;  %s2512_s6 = inlined_call_operand.vmem [shape: f32[1,128], index: 6, kind: input, shape index: {}]   ;;  %s2513_s7 = inlined_call_operand.vmem [shape: f32[16,128], index: 7, kind: output, shape index: {}]  }
   0x1   :  { %13 = vsyncpa [#allocation5], 0  ;;  %s2333_s24 = smov [#allocation2]   ;;  %s2285_s28 = scalar_lea.hbm %s2507_s1, 15360 }
   0x2   :  { %s21_s25 = sshll.u32 %s2333_s24, 4  ;;  %p2286_p0 = scmp.ne.s32.totalorder %s2507_s1, %s2285_s28  ;;  %s22_s25 = int_to_ptr.vmem [resolvable:$true] %s21_s25 }
   0x3   :  { %p2289_p1 = scmp.lt.u32.totalorder %s2285_s28, %s2507_s1 }
   0x5   :  { %p2291_p2 = pnand %p2289_p1, %p2286_p0 }
   0x7   :  { %2294 = shalt.err (!%p2291_p2)
}
   0x8   :  { %s2295_s10 = scalar_lea.vmem %s22_s25, 15360  ;;  %p2300_p4 = scmp.lt.s32.totalorder %s22_s25, %s22_s25 }
   0x9   :  { %p2296_p3 = scmp.ne.s32.totalorder %s22_s25, %s2295_s10  ;;  %p2301_p5 = scmp.lt.s32.totalorder %s2295_s10, %s2295_s10 }
   0xb   :  { %p2302_p6 = por %p2301_p5, %p2300_p4 }
   0xd   :  { %p2303_p7 = pnand %p2302_p6, %p2296_p3 }
   0xf   :  { %2306 = shalt.err (!%p2303_p7)
}
  0x10   :  { %s2334_s11 = smov 320   ;;  %s2335_s12 = smov 20  }
  0x11   :  { %27 = dma.hbm_to_vmem [thread:$0]  %s2507_s1, 15360, %s22_s25, [#allocation3], %s2334_s11, %s2334_s11, %s2335_s12  }
  0x12   :  { %s2336_s15 = smov [#allocation4]   ;;  %s2307_s19 = scalar_lea.hbm %s2509_s3, 5120 }
  0x13   :  { %s35_s16 = sshll.u32 %s2336_s15, 4  ;;  %p2308_p8 = scmp.ne.s32.totalorder %s2509_s3, %s2307_s19  ;;  %s36_s16 = int_to_ptr.vmem [resolvable:$true] %s35_s16 }
  0x14   :  { %p2311_p9 = scmp.lt.u32.totalorder %s2307_s19, %s2509_s3 }
  0x16   :  { %p2313_p10 = pnand %p2311_p9, %p2308_p8 }
  0x18   :  { %2316 = shalt.err (!%p2313_p10)
}
  0x19   :  { %s2317_s24 = scalar_lea.vmem %s36_s16, 5120  ;;  %p2322_p12 = scmp.lt.s32.totalorder %s36_s16, %s36_s16 }
  0x1a   :  { %p2318_p11 = scmp.ne.s32.totalorder %s36_s16, %s2317_s24  ;;  %p2323_p13 = scmp.lt.s32.totalorder %s2317_s24, %s2317_s24 }
  0x1c   :  { %p2324_p0 = por %p2323_p13, %p2322_p12 }
  0x1e   :  { %p2325_p1 = pnand %p2324_p0, %p2318_p11 }
  0x20   :  { %2328 = shalt.err (!%p2325_p1)
}
  0x21   :  { %s2337_s1 = smov 64   ;;  %s2338_s25 = smov 4  }
  0x22   :  { %41 = dma.hbm_to_vmem [thread:$0]  %s2509_s3, 5120, %s36_s16, [#allocation5], %s2337_s1, %s2337_s1, %s2338_s25  }
  0x23   :  { %2329 = dma.done.wait [#allocation3], 15360  }
  0x24   :  { %2330 = vsyncadd [#allocation3], 4294951936 }
  0x25   :  { %2331 = dma.done.wait [#allocation5], 5120  }
  0x26   :  { %2332 = vsyncadd [#allocation5], 4294962176  ;;  %v2065_v0 = vld [vmem:[#allocation2 + $0x4] ss:$20 sps:$4 sm:$0xff]   ;;  %v2067_v1 = vld [vmem:[#allocation2 + $0xc] ss:$20 sps:$4 sm:$0xff]  }
  0x27   :  { %870 = vmatprep.subr.bf16.mxu0 %v2065_v0  ;;  %v2069_v2 = vld [vmem:[#allocation2] ss:$20 sps:$4 sm:$0xff]   ;;  %v2070_v3 = vld [vmem:[#allocation2 + $0x8] ss:$20 sps:$4 sm:$0xff]   ;;  %956 = vmatprep.subr.bf16.mxu1 %v2067_v1  ;;  %v2076_v7 = vld [vmem:[#allocation2 + $0x30] ss:$20 sps:$4 sm:$0xff]  }
  0x28   :  { %v2071_v4 = vld [vmem:[#allocation2 + $0x2c] ss:$20 sps:$4 sm:$0xff]   ;;  %871 = vmatpush1.bf16.msra.mxu0 %v2069_v2  ;;  %957 = vmatpush1.bf16.msra.mxu1 %v2070_v3  ;;  %v2073_v5 = vld [vmem:[#allocation2 + $0x34] ss:$20 sps:$4 sm:$0xff]   ;;  %v2079_v9 = vld [vmem:[#allocation2 + $0x5c] ss:$20 sps:$4 sm:$0xff]  }
  0x29   :  { %v2075_v6 = vld [vmem:[#allocation2 + $0x28] ss:$20 sps:$4 sm:$0xff]   ;;  %872 = vmatprep.subr.bf16.mxu0 %v2071_v4  ;;  %958 = vmatprep.subr.bf16.mxu1 %v2073_v5  ;;  %v2081_v10 = vld [vmem:[#allocation2 + $0x50] ss:$20 sps:$4 sm:$0xff]   ;;  %v2082_v11 = vld [vmem:[#allocation2 + $0x58] ss:$20 sps:$4 sm:$0xff]  }
  0x2a   :  { %v2077_v8 = vld [vmem:[#allocation2 + $0x54] ss:$20 sps:$4 sm:$0xff]   ;;  %v2083_v12 = vld [vmem:[#allocation2 + $0x7c] ss:$20 sps:$4 sm:$0xff]   ;;  %v2085_v13 = vld [vmem:[#allocation2 + $0x84] ss:$20 sps:$4 sm:$0xff]  }
  0x2b   :  { %v2087_v14 = vld [vmem:[#allocation2 + $0x78] ss:$20 sps:$4 sm:$0xff]   ;;  %v2088_v15 = vld [vmem:[#allocation2 + $0x80] ss:$20 sps:$4 sm:$0xff]   ;;  %v2094_v19 = vld [vmem:[#allocation2 + $0xa8] ss:$20 sps:$4 sm:$0xff]  }
  0x2c   :  { %873 = vmatpush1.bf16.msra.mxu0 %v2075_v6  ;;  %959 = vmatpush1.bf16.msra.mxu1 %v2076_v7  ;;  %v2089_v16 = vld [vmem:[#allocation2 + $0xa4] ss:$20 sps:$4 sm:$0xff]   ;;  %v2091_v17 = vld [vmem:[#allocation2 + $0xac] ss:$20 sps:$4 sm:$0xff]   ;;  %v2097_v21 = vld [vmem:[#allocation2 + $0xd4] ss:$20 sps:$4 sm:$0xff]  }
  0x2d   :  { %874 = vmatprep.subr.bf16.mxu0 %v2077_v8  ;;  %960 = vmatprep.subr.bf16.mxu1 %v2079_v9  ;;  %v2093_v18 = vld [vmem:[#allocation2 + $0xa0] ss:$20 sps:$4 sm:$0xff]   ;;  %v2099_v22 = vld [vmem:[#allocation2 + $0xc8] ss:$20 sps:$4 sm:$0xff]   ;;  %v2100_v23 = vld [vmem:[#allocation2 + $0xd0] ss:$20 sps:$4 sm:$0xff]  }
  0x2e   :  { %v2095_v20 = vld [vmem:[#allocation2 + $0xcc] ss:$20 sps:$4 sm:$0xff]   ;;  %v2101_v24 = vld [vmem:[#allocation2 + $0xf4] ss:$20 sps:$4 sm:$0xff]   ;;  %v2103_v25 = vld [vmem:[#allocation2 + $0xfc] ss:$20 sps:$4 sm:$0xff]  }
  0x2f   :  { %v2105_v26 = vld [vmem:[#allocation2 + $0xf0] ss:$20 sps:$4 sm:$0xff]   ;;  %v2106_v27 = vld [vmem:[#allocation2 + $0xf8] ss:$20 sps:$4 sm:$0xff]   ;;  %v2112_v31 = vld [vmem:[#allocation2 + $0x120] ss:$20 sps:$4 sm:$0xff]  }
  0x30   :  { %875 = vmatpush1.bf16.msra.mxu0 %v2081_v10  ;;  %961 = vmatpush1.bf16.msra.mxu1 %v2082_v11  ;;  %v2107_v28 = vld [vmem:[#allocation2 + $0x11c] ss:$20 sps:$4 sm:$0xff]   ;;  %v2109_v29 = vld [vmem:[#allocation2 + $0x124] ss:$20 sps:$4 sm:$0xff]   ;;  %v2115_v33 = vld [vmem:[#allocation2 + $0x14c] ss:$20 sps:$4 sm:$0xff]  }
  0x31   :  { %876 = vmatprep.subr.bf16.mxu0 %v2083_v12  ;;  %962 = vmatprep.subr.bf16.mxu1 %v2085_v13  ;;  %v2111_v30 = vld [vmem:[#allocation2 + $0x118] ss:$20 sps:$4 sm:$0xff]   ;;  %v2117_v34 = vld [vmem:[#allocation2 + $0x140] ss:$20 sps:$4 sm:$0xff]   ;;  %v2118_v35 = vld [vmem:[#allocation2 + $0x148] ss:$20 sps:$4 sm:$0xff]  }
  0x32   :  { %v2113_v32 = vld [vmem:[#allocation2 + $0x144] ss:$20 sps:$4 sm:$0xff]   ;;  %v2119_v36 = vld [vmem:[#allocation2 + $0x16c] ss:$20 sps:$4 sm:$0xff]   ;;  %v2121_v37 = vld [vmem:[#allocation2 + $0x174] ss:$20 sps:$4 sm:$0xff]  }
  0x33   :  { %v2123_v38 = vld [vmem:[#allocation2 + $0x168] ss:$20 sps:$4 sm:$0xff]   ;;  %v2124_v39 = vld [vmem:[#allocation2 + $0x170] ss:$20 sps:$4 sm:$0xff]   ;;  %v2130_v43 = vld [vmem:[#allocation2 + $0x198] ss:$20 sps:$4 sm:$0xff]  }
  0x34   :  { %877 = vmatpush1.bf16.msra.mxu0 %v2087_v14  ;;  %963 = vmatpush1.bf16.msra.mxu1 %v2088_v15  ;;  %v2125_v40 = vld [vmem:[#allocation2 + $0x194] ss:$20 sps:$4 sm:$0xff]   ;;  %v2127_v41 = vld [vmem:[#allocation2 + $0x19c] ss:$20 sps:$4 sm:$0xff]   ;;  %v2133_v45 = vld [vmem:[#allocation2 + $0x1c4] ss:$20 sps:$4 sm:$0xff]  }
  0x35   :  { %878 = vmatprep.subr.bf16.mxu0 %v2089_v16  ;;  %964 = vmatprep.subr.bf16.mxu1 %v2091_v17  ;;  %v2129_v42 = vld [vmem:[#allocation2 + $0x190] ss:$20 sps:$4 sm:$0xff]   ;;  %v2135_v46 = vld [vmem:[#allocation2 + $0x1b8] ss:$20 sps:$4 sm:$0xff]   ;;  %v2136_v48 = vld [vmem:[#allocation2 + $0x1c0] ss:$20 sps:$4 sm:$0xff]  }
  0x36   :  { %v2131_v44 = vld [vmem:[#allocation2 + $0x1bc] ss:$20 sps:$4 sm:$0xff]   ;;  %v2137_v49 = vld [vmem:[#allocation2 + $0x1e4] ss:$20 sps:$4 sm:$0xff]   ;;  %v2139_v50 = vld [vmem:[#allocation2 + $0x1ec] ss:$20 sps:$4 sm:$0xff]  }
  0x37   :  { %v2409_v47 = vld [vmem:[%s2506_s0 + $0x4] ss:$12 sps:$4 sm:$0xff]   ;;  %v2141_v51 = vld [vmem:[#allocation2 + $0x1e0] ss:$20 sps:$4 sm:$0xff]   ;;  %v2142_v52 = vld [vmem:[#allocation2 + $0x1e8] ss:$20 sps:$4 sm:$0xff]  }
  0x38   :  { %879 = vmatpush1.bf16.msra.mxu0 %v2093_v18  ;;  %965 = vmatpush1.bf16.msra.mxu1 %v2094_v19  ;;  %v2143_v53 = vld [vmem:[#allocation2 + $0x20c] ss:$20 sps:$4 sm:$0xff]   ;;  %v2145_v54 = vld [vmem:[#allocation2 + $0x214] ss:$20 sps:$4 sm:$0xff]   ;;  %v2148_v56 = vld [vmem:[#allocation2 + $0x210] ss:$20 sps:$4 sm:$0xff]  }
  0x39   :  { %880 = vmatprep.subr.bf16.mxu0 %v2095_v20  ;;  %966 = vmatprep.subr.bf16.mxu1 %v2097_v21  ;;  %v2147_v55 = vld [vmem:[#allocation2 + $0x208] ss:$20 sps:$4 sm:$0xff]   ;;  %v2153_v59 = vld [vmem:[#allocation2 + $0x230] ss:$20 sps:$4 sm:$0xff]   ;;  %v2154_v60 = vld [vmem:[#allocation2 + $0x238] ss:$20 sps:$4 sm:$0xff]  }
  0x3a   :  { %902 = vmatprep.mubr.bf16.mxu0 %v2409_v47  ;;  %988 = vmatprep.mubr.bf16.mxu1 %v2409_v47  ;;  %v2149_v57 = vld [vmem:[#allocation2 + $0x234] ss:$20 sps:$4 sm:$0xff]   ;;  %v2151_v58 = vld [vmem:[#allocation2 + $0x23c] ss:$20 sps:$4 sm:$0xff]   ;;  %v2157_v62 = vld [vmem:[#allocation2 + $0x264] ss:$20 sps:$4 sm:$0xff]  }
  0x3b   :  { %v2155_v61 = vld [vmem:[#allocation2 + $0x25c] ss:$20 sps:$4 sm:$0xff]   ;;  %v2159_v63 = vld [vmem:[#allocation2 + $0x258] ss:$20 sps:$4 sm:$0xff]   ;;  %v2160_v0 = vld [vmem:[#allocation2 + $0x260] ss:$20 sps:$4 sm:$0xff]  }
  0x3c   :  { %881 = vmatpush1.bf16.msra.mxu0 %v2099_v22  ;;  %967 = vmatpush1.bf16.msra.mxu1 %v2100_v23  ;;  %v2165_v1 = vld [vmem:[#allocation2 + $0x284] ss:$20 sps:$4 sm:$0xff]   ;;  %v2168_v2 = vld [vmem:[#allocation2 + $0x28c] ss:$20 sps:$4 sm:$0xff]   ;;  %v2166_v4 = vld [vmem:[#allocation2 + $0x288] ss:$20 sps:$4 sm:$0xff]  }
  0x3d   :  { %882 = vmatprep.subr.bf16.mxu0 %v2101_v24  ;;  %968 = vmatprep.subr.bf16.mxu1 %v2103_v25  ;;  %v2163_v3 = vld [vmem:[#allocation2 + $0x280] ss:$20 sps:$4 sm:$0xff]   ;;  %v2170_v8 = vld [vmem:[#allocation2 + $0x2a8] ss:$20 sps:$4 sm:$0xff]   ;;  %v2173_v9 = vld [vmem:[#allocation2 + $0x2b0] ss:$20 sps:$4 sm:$0xff]  }
  0x3e   :  { %v2416_v5 = vld [vmem:[%s2506_s0] ss:$12 sps:$4 sm:$0xff]   ;;  %v2175_v7 = vld [vmem:[#allocation2 + $0x2b4] ss:$20 sps:$4 sm:$0xff]   ;;  %v2181_v11 = vld [vmem:[#allocation2 + $0x2dc] ss:$20 sps:$4 sm:$0xff]  }
  0x3f   :  { %v2172_v6 = vld [vmem:[#allocation2 + $0x2ac] ss:$20 sps:$4 sm:$0xff]   ;;  %v2178_v10 = vld [vmem:[#allocation2 + $0x2d4] ss:$20 sps:$4 sm:$0xff]   ;;  %v2176_v12 = vld [vmem:[#allocation2 + $0x2d0] ss:$20 sps:$4 sm:$0xff]  }
  0x40   :  { %883 = vmatpush1.bf16.msra.mxu0 %v2105_v26  ;;  %969 = vmatpush1.bf16.msra.mxu1 %v2106_v27  ;;  %v2339_v13 = vmov 0   ;;  %v2179_v14 = vld [vmem:[#allocation2 + $0x2d8] ss:$20 sps:$4 sm:$0xff]   ;;  %v2184_v15 = vld [vmem:[#allocation2 + $0x2fc] ss:$20 sps:$4 sm:$0xff]   ;;  %vm2341_vm0 = vmmov 0  }
  0x41   :  { %884 = vmatprep.subr.bf16.mxu0 %v2107_v28  ;;  %970 = vmatprep.subr.bf16.mxu1 %v2109_v29  ;;  %v2187_v16 = vld [vmem:[#allocation2 + $0x304] ss:$20 sps:$4 sm:$0xff]   ;;  %v2185_v18 = vld [vmem:[#allocation2 + $0x300] ss:$20 sps:$4 sm:$0xff]   ;;  %v2191_v22 = vld [vmem:[#allocation2 + $0x328] ss:$20 sps:$4 sm:$0xff]  }
  0x42   :  { %v2182_v17 = vld [vmem:[#allocation2 + $0x2f8] ss:$20 sps:$4 sm:$0xff]   ;;  %v2188_v21 = vld [vmem:[#allocation2 + $0x320] ss:$20 sps:$4 sm:$0xff]   ;;  %v2194_v25 = vld [vmem:[#allocation2 + $0x348] ss:$20 sps:$4 sm:$0xff]  }
  0x43   :  { %v2190_v19 = vld [vmem:[#allocation2 + $0x324] ss:$20 sps:$4 sm:$0xff]   ;;  %v2193_v20 = vld [vmem:[#allocation2 + $0x32c] ss:$20 sps:$4 sm:$0xff]   ;;  %v2199_v24 = vld [vmem:[#allocation2 + $0x354] ss:$20 sps:$4 sm:$0xff]  }
  0x44   :  { %885 = vmatpush1.bf16.msra.mxu0 %v2111_v30  ;;  %971 = vmatpush1.bf16.msra.mxu1 %v2112_v31  ;;  %v2196_v23 = vld [vmem:[#allocation2 + $0x34c] ss:$20 sps:$4 sm:$0xff]   ;;  %v2197_v26 = vld [vmem:[#allocation2 + $0x350] ss:$20 sps:$4 sm:$0xff]   ;;  %v2202_v27 = vld [vmem:[#allocation2 + $0x374] ss:$20 sps:$4 sm:$0xff]  }
  0x45   :  { %886 = vmatprep.subr.bf16.mxu0 %v2113_v32  ;;  %972 = vmatprep.subr.bf16.mxu1 %v2115_v33  ;;  %v2205_v28 = vld [vmem:[#allocation2 + $0x37c] ss:$20 sps:$4 sm:$0xff]   ;;  %v2203_v30 = vld [vmem:[#allocation2 + $0x378] ss:$20 sps:$4 sm:$0xff]  }
  0x46   :  { %v2200_v29 = vld [vmem:[#allocation2 + $0x370] ss:$20 sps:$4 sm:$0xff]   ;;  %v2206_v33 = vld [vmem:[#allocation2 + $0x398] ss:$20 sps:$4 sm:$0xff]  }
  0x47   :  { %v2208_v31 = vld [vmem:[#allocation2 + $0x39c] ss:$20 sps:$4 sm:$0xff]   ;;  %v2211_v32 = vld [vmem:[#allocation2 + $0x3a4] ss:$20 sps:$4 sm:$0xff]  }
  0x48   :  { %887 = vmatpush1.bf16.msra.mxu0 %v2117_v34  ;;  %973 = vmatpush1.bf16.msra.mxu1 %v2118_v35  ;;  %v2209_v34 = vld [vmem:[#allocation2 + $0x3a0] ss:$20 sps:$4 sm:$0xff]   ;;  %v2213_v35 = vld [vmem:[#allocation2 + $0x150] ss:$20 sps:$4 sm:$0xff]  }
  0x49   :  { %888 = vmatprep.subr.bf16.mxu0 %v2119_v36  ;;  %974 = vmatprep.subr.bf16.mxu1 %v2121_v37  ;;  %v2423_v36 = vld [vmem:[%s2506_s0 + $0x8] ss:$12 sps:$4 sm:$0xff]   ;;  %v2214_v37 = vld [vmem:[#allocation2 + $0x10] ss:$20 sps:$4 sm:$0xff]  }
  0x4c   :  { %889 = vmatpush1.bf16.msra.mxu0 %v2123_v38  ;;  %975 = vmatpush1.bf16.msra.mxu1 %v2124_v39  ;;  %v2215_v38 = vld [vmem:[#allocation2 + $0x290] ss:$20 sps:$4 sm:$0xff]   ;;  %v2340_v39 = vmov 0.0  }
  0x4d   :  { %890 = vmatprep.subr.bf16.mxu0 %v2125_v40  ;;  %976 = vmatprep.subr.bf16.mxu1 %v2127_v41  ;;  %v2216_v40 = vld [vmem:[#allocation2 + $0x178] ss:$20 sps:$4 sm:$0xff]  }
  0x4e   :  { %v2217_v41 = vld [vmem:[#allocation2 + $0x38] ss:$20 sps:$4 sm:$0xff]  }
  0x50   :  { %891 = vmatpush1.bf16.msra.mxu0 %v2129_v42  ;;  %977 = vmatpush1.bf16.msra.mxu1 %v2130_v43  ;;  %v2218_v42 = vld [vmem:[#allocation2 + $0x2b8] ss:$20 sps:$4 sm:$0xff]   ;;  %v2219_v43 = vld [vmem:[#allocation2 + $0x1a0] ss:$20 sps:$4 sm:$0xff]  }
  0x51   :  { %892 = vmatprep.subr.bf16.mxu0 %v2131_v44  ;;  %978 = vmatprep.subr.bf16.mxu1 %v2133_v45  ;;  %v2220_v44 = vld [vmem:[#allocation2 + $0x60] ss:$20 sps:$4 sm:$0xff]  }
  0x52   :  { %v2221_v45 = vld [vmem:[#allocation2 + $0x2e0] ss:$20 sps:$4 sm:$0xff]  }
  0x54   :  { %893 = vmatpush1.bf16.msra.mxu0 %v2135_v46  ;;  %979 = vmatpush1.bf16.msra.mxu1 %v2136_v48  ;;  %v2222_v46 = vld [vmem:[#allocation2 + $0x1c8] ss:$20 sps:$4 sm:$0xff]  }
  0x55   :  { %894 = vmatprep.subr.bf16.mxu0 %v2137_v49  ;;  %980 = vmatprep.subr.bf16.mxu1 %v2139_v50  ;;  %v2223_v48 = vld [vmem:[#allocation2 + $0x88] ss:$20 sps:$4 sm:$0xff]   ;;  %v2226_v50 = vld [vmem:[#allocation2 + $0xb0] ss:$20 sps:$4 sm:$0xff]  }
  0x56   :  { %v2224_v49 = vld [vmem:[#allocation2 + $0x308] ss:$20 sps:$4 sm:$0xff]  }
  0x58   :  { %895 = vmatpush1.bf16.msra.mxu0 %v2141_v51  ;;  %981 = vmatpush1.bf16.msra.mxu1 %v2142_v52  ;;  %v2227_v51 = vld [vmem:[#allocation2 + $0x330] ss:$20 sps:$4 sm:$0xff]   ;;  %v2228_v52 = vld [vmem:[#allocation2 + $0x218] ss:$20 sps:$4 sm:$0xff]  }
  0x59   :  { %896 = vmatprep.subr.bf16.mxu0 %v2143_v53  ;;  %982 = vmatprep.subr.bf16.mxu1 %v2145_v54  ;;  %v2229_v53 = vld [vmem:[#allocation2 + $0xd8] ss:$20 sps:$4 sm:$0xff]  }
  0x5a   :  { %v2230_v54 = vld [vmem:[#allocation2 + $0x358] ss:$20 sps:$4 sm:$0xff]  }
  0x5c   :  { %897 = vmatpush1.bf16.msra.mxu0 %v2147_v55  ;;  %983 = vmatpush1.bf16.msra.mxu1 %v2148_v56  ;;  %v2231_v55 = vld [vmem:[#allocation2 + $0x240] ss:$20 sps:$4 sm:$0xff]  }
  0x5d   :  { %898 = vmatprep.subr.bf16.mxu0 %v2149_v57  ;;  %984 = vmatprep.subr.bf16.mxu1 %v2151_v58  ;;  %v2232_v56 = vld [vmem:[#allocation2 + $0x100] ss:$20 sps:$4 sm:$0xff]   ;;  %v2234_v58 = vld [vmem:[#allocation2 + $0x268] ss:$20 sps:$4 sm:$0xff]  }
  0x5e   :  { %v2233_v57 = vld [vmem:[#allocation2 + $0x380] ss:$20 sps:$4 sm:$0xff]  }
  0x60   :  { %899 = vmatpush1.bf16.msra.mxu0 %v2153_v59  ;;  %985 = vmatpush1.bf16.msra.mxu1 %v2154_v60  ;;  %v2235_v59 = vld [vmem:[#allocation2 + $0x128] ss:$20 sps:$4 sm:$0xff]  }
  0x61   :  { %900 = vmatprep.subr.bf16.mxu0 %v2155_v61  ;;  %986 = vmatprep.subr.bf16.mxu1 %v2157_v62  ;;  %v2236_v60 = vld [vmem:[#allocation2 + $0x3a8] ss:$20 sps:$4 sm:$0xff]   ;;  %v2237_v61 = vld [vmem:[#allocation4 + $0x40] sm:$0xff]  }
  0x62   :  { %v2238_v62 = vld [vmem:[#allocation4 + $0xc0] sm:$0xff]  }
  0x64   :  { %901 = vmatpush1.bf16.msra.mxu0 %v2159_v63  ;;  %987 = vmatpush1.bf16.msra.mxu1 %v2160_v0  ;;  %v2239_v63 = vld [vmem:[#allocation4] sm:$0xff]  }
  0x65   :  { %913 = vmatprep.subr.bf16.mxu0 %v2165_v1  ;;  %999 = vmatprep.subr.bf16.mxu1 %v2168_v2  ;;  %v2240_v0 = vld [vmem:[#allocation4 + $0x80] sm:$0xff]   ;;  %v2241_v1 = vld [vmem:[#allocation4 + $0x48] sm:$0xff]  }
  0x66   :  { %v2242_v2 = vld [vmem:[#allocation4 + $0xc8] sm:$0xff]  }
  0x67   :  { %903 = vmatmul.mubr.bf16.vlgmr.msra.gmra.mrb[0].mxu0 %v2416_v5  ;;  %989 = vmatmul.mubr.bf16.vlgmr.msra.gmra.mrb[0].mxu1 %v2416_v5 }
  0x68   :  { %914 = vmatpush1.bf16.msra.mxu0 %v2163_v3  ;;  %1000 = vmatpush1.bf16.msra.mxu1 %v2166_v4  ;;  %v2243_v3 = vld [vmem:[#allocation4 + $0x8] sm:$0xff]  }
  0x69   :  { %915 = vmatprep.subr.bf16.mxu0 %v2172_v6  ;;  %1001 = vmatprep.subr.bf16.mxu1 %v2175_v7  ;;  %v2244_v4 = vld [vmem:[#allocation4 + $0x88] sm:$0xff]   ;;  %v2245_v6 = vld [vmem:[#allocation4 + $0x50] sm:$0xff]  }
  0x6a   :  { %945 = vmatprep.mubr.bf16.mxu0 %v2339_v13  ;;  %1031 = vmatprep.mubr.bf16.mxu1 %v2339_v13  ;;  %v2246_v7 = vld [vmem:[#allocation4 + $0xd0] sm:$0xff]   ;;  %v2253_v13 = vld [vmem:[#allocation4 + $0x60] sm:$0xff]  }
  0x6c   :  { %916 = vmatpush1.bf16.msra.mxu0 %v2170_v8  ;;  %1002 = vmatpush1.bf16.msra.mxu1 %v2173_v9  ;;  %v2247_v8 = vld [vmem:[#allocation4 + $0x10] sm:$0xff]  }
  0x6d   :  { %917 = vmatprep.subr.bf16.mxu0 %v2178_v10  ;;  %1003 = vmatprep.subr.bf16.mxu1 %v2181_v11  ;;  %v2248_v9 = vld [vmem:[#allocation4 + $0x90] sm:$0xff]   ;;  %v2249_v10 = vld [vmem:[#allocation4 + $0x58] sm:$0xff]  }
  0x6e   :  { %v2250_v11 = vld [vmem:[#allocation4 + $0xd8] sm:$0xff]  }
  0x70   :  { %918 = vmatpush1.bf16.msra.mxu0 %v2176_v12  ;;  %1004 = vmatpush1.bf16.msra.mxu1 %v2179_v14  ;;  %v2252_v12 = vld [vmem:[#allocation4 + $0x98] sm:$0xff]   ;;  %v2254_v14 = vld [vmem:[#allocation4 + $0xe0] sm:$0xff]  }
  0x71   :  { %919 = vmatprep.subr.bf16.mxu0 %v2184_v15  ;;  %1005 = vmatprep.subr.bf16.mxu1 %v2187_v16  ;;  %v2255_v15 = vld [vmem:[#allocation4 + $0x20] sm:$0xff]  }
  0x72   :  { %v2256_v16 = vld [vmem:[#allocation4 + $0xa0] sm:$0xff]  }
  0x74   :  { %920 = vmatpush1.bf16.msra.mxu0 %v2182_v17  ;;  %1006 = vmatpush1.bf16.msra.mxu1 %v2185_v18  ;;  %v2257_v17 = vld [vmem:[#allocation4 + $0x68] sm:$0xff]  }
  0x75   :  { %921 = vmatprep.subr.bf16.mxu0 %v2190_v19  ;;  %1007 = vmatprep.subr.bf16.mxu1 %v2193_v20  ;;  %v2258_v18 = vld [vmem:[#allocation4 + $0xe8] sm:$0xff]  }
  0x76   :  { %v2259_v19 = vld [vmem:[#allocation4 + $0x28] sm:$0xff]  }
  0x77   :  { %v2260_v20 = vld [vmem:[#allocation4 + $0xa8] sm:$0xff]  }
  0x78   :  { %922 = vmatpush1.bf16.msra.mxu0 %v2188_v21  ;;  %1008 = vmatpush1.bf16.msra.mxu1 %v2191_v22  ;;  %v2261_v21 = vld [vmem:[#allocation4 + $0x70] sm:$0xff]  }
  0x79   :  { %923 = vmatprep.subr.bf16.mxu0 %v2196_v23  ;;  %1009 = vmatprep.subr.bf16.mxu1 %v2199_v24  ;;  %v2262_v22 = vld [vmem:[#allocation4 + $0xf0] sm:$0xff]  }
  0x7a   :  { %v2263_v23 = vld [vmem:[#allocation4 + $0x30] sm:$0xff]  }
  0x7b   :  { %v2264_v24 = vld [vmem:[#allocation4 + $0xb0] sm:$0xff]  }
  0x7c   :  { %924 = vmatpush1.bf16.msra.mxu0 %v2194_v25  ;;  %1010 = vmatpush1.bf16.msra.mxu1 %v2197_v26  ;;  %v2265_v25 = vld [vmem:[#allocation4 + $0x78] sm:$0xff]  }
  0x7d   :  { %925 = vmatprep.subr.bf16.mxu0 %v2202_v27  ;;  %1011 = vmatprep.subr.bf16.mxu1 %v2205_v28  ;;  %v2266_v26 = vld [vmem:[#allocation4 + $0xf8] sm:$0xff]  }
  0x7e   :  { %v2267_v27 = vld [vmem:[#allocation4 + $0x38] sm:$0xff]  }
  0x7f   :  { %v2268_v28 = vld [vmem:[#allocation4 + $0xb8] sm:$0xff]  }
  0x80   :  { %926 = vmatpush1.bf16.msra.mxu0 %v2200_v29  ;;  %1012 = vmatpush1.bf16.msra.mxu1 %v2203_v30  ;;  %v205_v29 = vlaneseq }
  0x81   :  { %927 = vmatprep.subr.bf16.mxu0 %v2208_v31  ;;  %1013 = vmatprep.subr.bf16.mxu1 %v2211_v32 }
  0x82   :  { %v2442_v30 = vshrl.u32 %v205_v29, 7 }
  0x84   :  { %928 = vmatpush1.bf16.msra.mxu0 %v2206_v33  ;;  %1014 = vmatpush1.bf16.msra.mxu1 %v2209_v34  ;;  %v207_v31 = vsub.s32 0, %v2442_v30  ;;  %v215_v32 = vsub.s32 2, %v2442_v30  ;;  %v203_v33 = vld [vmem:[%s2508_s2] sm:$0x1f]  ;;  %v211_v34 = vsub.s32 1, %v2442_v30 }
  0x85   :  { %1887 = vmatprep.subr.bf16.mxu0 %v2213_v35  ;;  %1980 = vmatprep.subr.bf16.mxu1 %v2340_v39  ;;  %v219_v35 = vsub.s32 3, %v2442_v30 }
  0x87   :  { %946 = vmatmul.mubr.bf16.vlgmr.msra.gmra.mrb[0].mxu0 %v2423_v36  ;;  %1032 = vmatmul.mubr.bf16.vlgmr.msra.gmra.mrb[0].mxu1 %v2423_v36 }
  0x88   :  { %1888 = vmatpush3.bf16.msra.mxu0 %v2214_v37  ;;  %1981 = vmatpush3.bf16.msra.mxu1 %v2215_v38  ;;  %v216_v37 = vrot.slane %v203_v33, %v215_v32  ;;  %v212_v38 = vrot.slane %v203_v33, %v211_v34  ;;  %v2277_v32 = vld [vmem:[%s2511_s5] sm:$0xff]   ;;  %v2279_v34 = vld [vmem:[%s2511_s5 + $0x10] sm:$0xff]  }
  0x89   :  { %1889 = vmatprep.subr.bf16.mxu0 %v2216_v40  ;;  %1982 = vmatprep.subr.bf16.mxu1 %v2340_v39  ;;  %v220_v40 = vrot.slane %v203_v33, %v219_v35  ;;  %v2280_v35 = vld [vmem:[%s2511_s5 + $0x18] sm:$0xff]  }
  0x8a   :  { %1074 = vmatprep.mubr.bf16.mxu0 %v2409_v47  ;;  %1996 = vmatprep.mubr.msk.bf16.mxu1 %vm2341_vm0, %v2340_v39  ;;  %v2225_v47 = vld [vmem:[#allocation2 + $0x1f0] ss:$20 sps:$4 sm:$0xff]  }
  0x8c   :  { %1890 = vmatpush3.bf16.msra.mxu0 %v2217_v41  ;;  %1983 = vmatpush3.bf16.msra.mxu1 %v2218_v42 }
  0x8d   :  { %1891 = vmatprep.subr.bf16.mxu0 %v2219_v43  ;;  %1984 = vmatprep.subr.bf16.mxu1 %v2340_v39 }
  0x90   :  { %1892 = vmatpush3.bf16.msra.mxu0 %v2220_v44  ;;  %1985 = vmatpush3.bf16.msra.mxu1 %v2221_v45 }
  0x91   :  { %1893 = vmatprep.subr.bf16.mxu0 %v2222_v46  ;;  %1986 = vmatprep.subr.bf16.mxu1 %v2340_v39 }
  0x94   :  { %1894 = vmatpush3.bf16.msra.mxu0 %v2223_v48  ;;  %1987 = vmatpush3.bf16.msra.mxu1 %v2224_v49 }
  0x95   :  { %1895 = vmatprep.subr.bf16.mxu0 %v2225_v47  ;;  %1988 = vmatprep.subr.bf16.mxu1 %v2340_v39 }
  0x98   :  { %1896 = vmatpush3.bf16.msra.mxu0 %v2226_v50  ;;  %1989 = vmatpush3.bf16.msra.mxu1 %v2227_v51 }
  0x99   :  { %1897 = vmatprep.subr.bf16.mxu0 %v2228_v52  ;;  %1990 = vmatprep.subr.bf16.mxu1 %v2340_v39 }
  0x9c   :  { %1898 = vmatpush3.bf16.msra.mxu0 %v2229_v53  ;;  %1991 = vmatpush3.bf16.msra.mxu1 %v2230_v54 }
  0x9d   :  { %1899 = vmatprep.subr.bf16.mxu0 %v2231_v55  ;;  %1992 = vmatprep.subr.bf16.mxu1 %v2340_v39 }
  0xa0   :  { %1900 = vmatpush3.bf16.msra.mxu0 %v2232_v56  ;;  %1993 = vmatpush3.bf16.msra.mxu1 %v2233_v57 }
  0xa1   :  { %1901 = vmatprep.subr.bf16.mxu0 %v2234_v58  ;;  %1994 = vmatprep.subr.bf16.mxu1 %v2340_v39 }
  0xa4   :  { %1902 = vmatpush3.bf16.msra.mxu0 %v2235_v59  ;;  %1995 = vmatpush3.bf16.msra.mxu1 %v2236_v60 }
  0xa5   :  { %1918 = vmatprep.subr.bf16.mxu0 %v2237_v61  ;;  %1940 = vmatprep.subr.bf16.mxu1 %v2238_v62 }
  0xa7   :  { %1075 = vmatmul.mubr.bf16.vlgmr.msra.gmra.mrb[4].mxu0 %v2416_v5  ;;  %1997 = vmatmul.mubr.bf16.vlgmr.msra.gmra.mrb[4].mxu1 %v2423_v36  ;;  %v2251_v5 = vld [vmem:[#allocation4 + $0x18] sm:$0xff]   ;;  %v208_v36 = vrot.slane %v203_v33, %v207_v31 }
  0xa8   :  { %1919 = vmatpush3.bf16.msra.mxu0 %v2239_v63  ;;  %1941 = vmatpush3.bf16.msra.mxu1 %v2240_v0 }
  0xa9   :  { %1920 = vmatprep.subr.bf16.mxu0 %v2241_v1  ;;  %1942 = vmatprep.subr.bf16.mxu1 %v2242_v2 }
  0xac   :  { %1921 = vmatpush3.bf16.msra.mxu0 %v2243_v3  ;;  %1943 = vmatpush3.bf16.msra.mxu1 %v2244_v4 }
  0xad   :  { %1922 = vmatprep.subr.bf16.mxu0 %v2245_v6  ;;  %1944 = vmatprep.subr.bf16.mxu1 %v2246_v7  ;;  %v2269_v6 = vld [vmem:[#allocation4 + $0x100] sm:$0xff]   ;;  %v2270_v7 = vld [vmem:[#allocation4 + $0x108] sm:$0xff]  }
  0xb0   :  { %1923 = vmatpush3.bf16.msra.mxu0 %v2247_v8  ;;  %1945 = vmatpush3.bf16.msra.mxu1 %v2248_v9  ;;  %v2271_v8 = vld [vmem:[#allocation4 + $0x110] sm:$0xff]   ;;  %v2272_v9 = vld [vmem:[#allocation4 + $0x118] sm:$0xff]  }
  0xb1   :  { %1924 = vmatprep.subr.bf16.mxu0 %v2249_v10  ;;  %1946 = vmatprep.subr.bf16.mxu1 %v2250_v11  ;;  %v2273_v10 = vld [vmem:[#allocation4 + $0x120] sm:$0xff]   ;;  %v223_v11 = vsub.s32 4, %v2442_v30 }
  0xb4   :  { %1925 = vmatpush3.bf16.msra.mxu0 %v2251_v5  ;;  %1947 = vmatpush3.bf16.msra.mxu1 %v2252_v12  ;;  %v2274_v5 = vld [vmem:[#allocation4 + $0x128] sm:$0xff]  }
  0xb5   :  { %1926 = vmatprep.subr.bf16.mxu0 %v2253_v13  ;;  %1948 = vmatprep.subr.bf16.mxu1 %v2254_v14  ;;  %v224_v13 = vrot.slane %v203_v33, %v223_v11  ;;  %v2278_v33 = vld [vmem:[%s2511_s5 + $0x8] sm:$0xff]  }
  0xb8   :  { %1927 = vmatpush3.bf16.msra.mxu0 %v2255_v15  ;;  %1949 = vmatpush3.bf16.msra.mxu1 %v2256_v16  ;;  %v2275_v15 = vld [vmem:[#allocation4 + $0x130] sm:$0xff]  }
  0xb9   :  { %1928 = vmatprep.subr.bf16.mxu0 %v2257_v17  ;;  %1950 = vmatprep.subr.bf16.mxu1 %v2258_v18 }
  0xbc   :  { %1929 = vmatpush3.bf16.msra.mxu0 %v2259_v19  ;;  %1951 = vmatpush3.bf16.msra.mxu1 %v2260_v20 }
  0xbd   :  { %1930 = vmatprep.subr.bf16.mxu0 %v2261_v21  ;;  %1952 = vmatprep.subr.bf16.mxu1 %v2262_v22 }
  0xc0   :  { %1931 = vmatpush3.bf16.msra.mxu0 %v2263_v23  ;;  %1953 = vmatpush3.bf16.msra.mxu1 %v2264_v24 }
  0xc1   :  { %1932 = vmatprep.subr.bf16.mxu0 %v2265_v25  ;;  %1954 = vmatprep.subr.bf16.mxu1 %v2266_v26  ;;  %v2276_v25 = vld [vmem:[#allocation4 + $0x138] sm:$0xff]  }
  0xc4   :  { %1933 = vmatpush3.bf16.msra.mxu0 %v2267_v27  ;;  %1955 = vmatpush3.bf16.msra.mxu1 %v2268_v28 }
  0xc5   :  { %2000 = vmatprep.subr.bf16.mxu0 %v2340_v39  ;;  %2020 = vmatprep.subr.bf16.mxu1 %v2340_v39 }
 0x15a   :  { %v947_v41 = vpop.f32.mrb[0].mxu0  ;;  %v1033_v42 = vpop.f32.mrb[0].mxu1 }
 0x15b   :  { %v2040_v43 = vadd.f32 %v947_v41, %v208_v36  ;;  %v2044_v44 = vadd.f32 %v1033_v42, %v216_v37  ;;  %v949_v45 = vpop.f32.mrb[1].mxu0  ;;  %v1035_v46 = vpop.f32.mrb[1].mxu1 }
 0x15c   :  { %v2041_v48 = vadd.f32 %v949_v45, %v212_v38  ;;  %v2045_v49 = vadd.f32 %v1035_v46, %v220_v40  ;;  %v951_v47 = vpop.f32.mrb[2].mxu0  ;;  %v1037_v50 = vpop.f32.mrb[2].mxu1 }
 0x15d   :  { %v2042_v51 = vadd.f32 %v951_v47, %v208_v36  ;;  %v2046_v52 = vadd.f32 %v1037_v50, %v216_v37  ;;  %v953_v53 = vpop.f32.mrb[3].mxu0  ;;  %v1039_v54 = vpop.f32.mrb[3].mxu1  ;;  %v1124_v57 = vmax.f32 %v2040_v43, 0.0  ;;  %v1126_v58 = vmax.f32 %v2044_v44, 0.0  ;;  %v2281_v36 = vld [vmem:[%s2511_s5 + $0x20] sm:$0xff]   ;;  %v2282_v37 = vld [vmem:[%s2511_s5 + $0x28] sm:$0xff]  }
 0x15e   :  { %v2043_v55 = vadd.f32 %v953_v53, %v212_v38  ;;  %v2047_v56 = vadd.f32 %v1039_v54, %v220_v40  ;;  %v1125_v61 = vmax.f32 %v2041_v48, 0.0  ;;  %v1127_v62 = vmax.f32 %v2045_v49, 0.0  ;;  %v2283_v38 = vld [vmem:[%s2511_s5 + $0x30] sm:$0xff]   ;;  %v2284_v40 = vld [vmem:[%s2511_s5 + $0x38] sm:$0xff]   ;;  %v1837_v43 = vld [vmem:[%s2510_s4] ss:$0 sm:$0xff] }
 0x15f   :  { %v1129_v59 = vmax.f32 %v2042_v51, 0.0  ;;  %v1131_v60 = vmax.f32 %v2046_v52, 0.0 }
 0x160   :  { %v1130_v63 = vmax.f32 %v2043_v55, 0.0  ;;  %v1132_v0 = vmax.f32 %v2047_v56, 0.0 }
 0x161   :  { %v1134_v1 = vpack.c.bf16 %v1129_v59, %v1124_v57  ;;  %v1136_v2 = vpack.c.bf16 %v1131_v60, %v1126_v58 }
 0x162   :  { %v1135_v3 = vpack.c.bf16 %v1130_v63, %v1125_v61  ;;  %v1137_v4 = vpack.c.bf16 %v1132_v0, %v1127_v62 }
 0x164   :  { %1498 = vmatprep.mubr.bf16.mxu0 %v1135_v3  ;;  %1539 = vmatprep.mubr.bf16.mxu1 %v1137_v4 }
 0x165   :  { %1499 = vmatmul.mubr.bf16.vlgmr.msra.gmra.mrb[8].mxu0 %v1134_v1  ;;  %1540 = vmatmul.mubr.bf16.vlgmr.msra.gmra.mrb[8].mxu1 %v1136_v2  ;;  %v1878_v2 = vld [vmem:[%s2512_s6] ss:$0 sm:$0xff] }
 0x166   :  { %2001 = vmatpush3.bf16.msra.mxu0 %v2269_v6  ;;  %2016 = vmatprep.mubr.msk.bf16.mxu0 %vm2341_vm0, %v2340_v39 }
 0x167   :  { %2002 = vmatprep.subr.bf16.mxu0 %v2340_v39  ;;  %2036 = vmatprep.mubr.msk.bf16.mxu1 %vm2341_vm0, %v2340_v39 }
 0x168   :  { %2021 = vmatpush3.bf16.msra.mxu1 %v2277_v32 }
 0x169   :  { %2022 = vmatprep.subr.bf16.mxu1 %v2340_v39 }
 0x16a   :  { %2003 = vmatpush3.bf16.msra.mxu0 %v2270_v7 }
 0x16b   :  { %2004 = vmatprep.subr.bf16.mxu0 %v2340_v39 }
 0x16c   :  { %2023 = vmatpush3.bf16.msra.mxu1 %v2278_v33 }
 0x16d   :  { %2024 = vmatprep.subr.bf16.mxu1 %v2340_v39 }
 0x16e   :  { %2005 = vmatpush3.bf16.msra.mxu0 %v2271_v8 }
 0x16f   :  { %2006 = vmatprep.subr.bf16.mxu0 %v2340_v39 }
 0x170   :  { %2025 = vmatpush3.bf16.msra.mxu1 %v2279_v34 }
 0x171   :  { %2026 = vmatprep.subr.bf16.mxu1 %v2340_v39 }
 0x172   :  { %2007 = vmatpush3.bf16.msra.mxu0 %v2272_v9 }
 0x173   :  { %2008 = vmatprep.subr.bf16.mxu0 %v2340_v39 }
 0x174   :  { %2027 = vmatpush3.bf16.msra.mxu1 %v2280_v35 }
 0x175   :  { %2028 = vmatprep.subr.bf16.mxu1 %v2340_v39 }
 0x176   :  { %2009 = vmatpush3.bf16.msra.mxu0 %v2273_v10 }
 0x177   :  { %2010 = vmatprep.subr.bf16.mxu0 %v2340_v39 }
 0x178   :  { %2029 = vmatpush3.bf16.msra.mxu1 %v2281_v36 }
 0x179   :  { %2030 = vmatprep.subr.bf16.mxu1 %v2340_v39 }
 0x17a   :  { %v1903_v12 = vpop.f32.mrb[4].mxu0  ;;  %v1117_v14 = vpop.f32.mrb[4].mxu1  ;;  %2011 = vmatpush3.bf16.msra.mxu0 %v2274_v5 }
 0x17b   :  { %v1904_v16 = vpop.f32.mrb[5].mxu0  ;;  %v1998_v17 = vpop.f32.mrb[5].mxu1  ;;  %2012 = vmatprep.subr.bf16.mxu0 %v2340_v39 }
 0x17c   :  { %v1905_v18 = vadd.f32 %v1904_v16, %v1903_v12  ;;  %v1906_v19 = vpop.f32.mrb[6].mxu0  ;;  %v1120_v20 = vpop.f32.mrb[6].mxu1  ;;  %2031 = vmatpush3.bf16.msra.mxu1 %v2282_v37 }
 0x17d   :  { %v1907_v21 = vpop.f32.mrb[7].mxu0  ;;  %v1999_v22 = vpop.f32.mrb[7].mxu1  ;;  %2032 = vmatprep.subr.bf16.mxu1 %v2340_v39 }
 0x17e   :  { %v1077_v23 = vadd.f32 %v1905_v18, %v224_v13  ;;  %v1908_v24 = vadd.f32 %v1907_v21, %v1906_v19  ;;  %2013 = vmatpush3.bf16.msra.mxu0 %v2275_v15 }
 0x17f   :  { %2014 = vmatprep.subr.bf16.mxu0 %v2340_v39 }
 0x180   :  { %v1118_v26 = vadd.f32 %v1117_v14, %v1077_v23  ;;  %v1080_v27 = vadd.f32 %v1908_v24, %v224_v13  ;;  %2033 = vmatpush3.bf16.msra.mxu1 %v2283_v38 }
 0x181   :  { %2034 = vmatprep.subr.bf16.mxu1 %v2340_v39 }
 0x182   :  { %v1121_v28 = vadd.f32 %v1120_v20, %v1080_v27  ;;  %2015 = vmatpush3.bf16.msra.mxu0 %v2276_v25  ;;  %v1128_v29 = vmax.f32 %v1118_v26, 0.0 }
 0x184   :  { %v1133_v30 = vmax.f32 %v1121_v28, 0.0  ;;  %2035 = vmatpush3.bf16.msra.mxu1 %v2284_v40 }
 0x186   :  { %v1138_v31 = vpack.c.bf16 %v1133_v30, %v1128_v29 }
 0x188   :  { %2017 = vmatmul.mubr.bf16.vlgmr.msra.gmra.mrb[12].mxu0 %v1138_v31 }
 0x238   :  { %v1934_v41 = vpop.f32.mrb[8].mxu0  ;;  %v1956_v42 = vpop.f32.mrb[8].mxu1 }
 0x239   :  { %v1935_v44 = vpop.f32.mrb[9].mxu0  ;;  %v1957_v45 = vpop.f32.mrb[9].mxu1 }
 0x23a   :  { %v1936_v46 = vadd.f32 %v1935_v44, %v1934_v41  ;;  %v1958_v48 = vadd.f32 %v1957_v45, %v1956_v42  ;;  %v1937_v49 = vpop.f32.mrb[10].mxu0  ;;  %v1959_v47 = vpop.f32.mrb[10].mxu1 }
 0x23b   :  { %v1938_v50 = vpop.f32.mrb[11].mxu0  ;;  %v1960_v51 = vpop.f32.mrb[11].mxu1 }
 0x23c   :  { %v1501_v39 = vadd.f32 %v1936_v46, %v1837_v43  ;;  %v1939_v52 = vadd.f32 %v1938_v50, %v1937_v49  ;;  %v1961_v53 = vadd.f32 %v1960_v51, %v1959_v47 }
 0x23e   :  { %v1504_v54 = vadd.f32 %v1939_v52, %v1837_v43  ;;  %v1542_v55 = vadd.f32 %v1958_v48, %v1501_v39 }
 0x240   :  { %v1545_v56 = vadd.f32 %v1961_v53, %v1504_v54 }
 0x25b   :  { %v1582_v57 = vpop.f32.mrb[12].mxu0 }
 0x25c   :  { %v1583_v58 = vadd.f32 %v1582_v57, %v1542_v55  ;;  %v2018_v59 = vpop.f32.mrb[13].mxu0 }
 0x25d   :  { %v1585_v60 = vpop.f32.mrb[14].mxu0 }
 0x25e   :  { %v1586_v61 = vadd.f32 %v1585_v60, %v1545_v56  ;;  %v2019_v62 = vpop.f32.mrb[15].mxu0  ;;  %v1589_v63 = vmax.f32 %v1583_v58, 0.0 }
 0x260   :  { %v1590_v0 = vmax.f32 %v1586_v61, 0.0 }
 0x262   :  { %v1591_v1 = vpack.c.bf16 %v1590_v0, %v1589_v63 }
 0x264   :  { %2037 = vmatmul.mubr.bf16.vlgmr.msra.gmra.mrb[12].mxu1 %v1591_v1 }
 0x337   :  { %v1697_v3 = vpop.f32.mrb[12].mxu1 }
 0x338   :  { %v1698_v4 = vadd.f32 %v1878_v2, %v1697_v3  ;;  %v2038_v6 = vpop.f32.mrb[13].mxu1 }
 0x339   :  { %v1700_v7 = vpop.f32.mrb[14].mxu1 }
 0x33a   :  { %v1704_v8 = vmax.f32 %v1698_v4, 0.0  ;;  %v1701_v9 = vadd.f32 %v1878_v2, %v1700_v7  ;;  %v2039_v10 = vpop.f32.mrb[15].mxu1 }
 0x33c   :  { %1706 = vst [vmem:[%s2513_s7] sm:$0xff] %v1704_v8  ;;  %v1705_v11 = vmax.f32 %v1701_v9, 0.0 }
 0x33e   :  { %1707 = vst [vmem:[%s2513_s7 + $0x8] sm:$0xff] %v1705_v11 }
 0x33f   :  { %1712 = vsyncpa [#allocation3], 1 }
 0x340   :  { %1713 = vsyncpa [#allocation5], 1 }

</bundles_post_ra>
